<compile_context>
chip_gen: v7x
topology: tpu7x:2x2x1
jax: 0.10.0
libtpu: 0.0.40
codegen_flags: <defaults>
</compile_context>

<pallas_src>
import functools

import jax
import jax.numpy as jnp
from jax.experimental import pallas as pl
from jax.experimental.pallas import tpu as pltpu

# Tile footprints are sized so double-buffered blocks stay well under 32 MiB scoped VMEM,
# which is also safe on v7x (64 MiB physical VMEM, 32 MiB scoped default).
_VMEM_LIMIT = 32 * 1024 * 1024


def _round_up(x, m):
    return (x + m - 1) // m * m


def _pad2(x, rows, cols):
    pr, pc = rows - x.shape[0], cols - x.shape[1]
    if pr or pc:
        x = jnp.pad(x, ((0, pr), (0, pc)))
    return x


def _bn_scale_shift(bn):
    scale = bn['gamma'] / jnp.sqrt(bn['var'] + 1e-5)
    shift = bn['beta'] - bn['mean'] * scale
    return scale, shift


# ----------------------------- Pallas kernels ------------------------------

def _mm_affine_kernel(a_ref, w_ref, scale_ref, shift_ref, *rest, relu, has_res):
    """acc += A @ W (bf16 operands, f32 acc); epilogue: *scale + shift [+ res] [ReLU]."""
    if has_res:
        res_ref, o_ref, acc_ref = rest
    else:
        res_ref = None
        o_ref, acc_ref = rest

    @pl.when(pl.program_id(2) == 0)
    def _init():
        acc_ref[...] = jnp.zeros_like(acc_ref)

    acc_ref[...] += jnp.dot(a_ref[...], w_ref[...], preferred_element_type=jnp.float32)

    @pl.when(pl.program_id(2) == pl.num_programs(2) - 1)
    def _finalize():
        out = acc_ref[...] * scale_ref[...] + shift_ref[...]
        if has_res:
            out = out + res_ref[...].astype(jnp.float32)
        if relu:
            out = jnp.maximum(out, 0.0)
        o_ref[...] = out.astype(o_ref.dtype)


def mm_affine(a, w, scale, shift, *, relu=False, residual=None, out_dtype=jnp.float32):
    """out = (a @ w) * scale + shift [+ residual] [ReLU], tiled over (M, N, K).

    a: (M, K), w: (K, N), scale/shift: (N,), residual: (M, N) or None.
    M/N are zero-padded to tile multiples (N lane-dense, multiple of 128)."""
    M, K = a.shape
    K2, N = w.shape
    assert K == K2

    Np = _round_up(N, 128)
    tn = 256 if Np % 256 == 0 else 128          # 256-wide N tiles feed the v6e/v7x MXU
    if K % 128 == 0:
        tk = 512 if K % 512 == 0 else (256 if K % 256 == 0 else 128)
    else:
        tk = K                                   # small irregular K (e.g. im2col K=27): one block
    tm = 512 if M >= 512 else _round_up(max(M, 8), 8)
    Mp = _round_up(M, tm)
    grid = (Mp // tm, Np // tn, K // tk)

    a_p = _pad2(a.astype(jnp.bfloat16), Mp, K)
    w_p = _pad2(w.astype(jnp.bfloat16), K, Np)
    scale_p = _pad2(scale.reshape(1, N).astype(jnp.float32), 1, Np)
    shift_p = _pad2(shift.reshape(1, N).astype(jnp.float32), 1, Np)

    in_specs = [
        pl.BlockSpec((tm, tk), lambda i, j, k: (i, k)),
        pl.BlockSpec((tk, tn), lambda i, j, k: (k, j)),
        pl.BlockSpec((1, tn), lambda i, j, k: (0, j)),
        pl.BlockSpec((1, tn), lambda i, j, k: (0, j)),
    ]
    args = [a_p, w_p, scale_p, shift_p]
    has_res = residual is not None
    if has_res:
        in_specs.append(pl.BlockSpec((tm, tn), lambda i, j, k: (i, j)))
        args.append(_pad2(residual, Mp, Np))

    bytes_io = (a_p.size * 2 + w_p.size * 2 + Mp * Np * jnp.dtype(out_dtype).itemsize
                + (Mp * Np * 2 if has_res else 0))
    out = pl.pallas_call(
        functools.partial(_mm_affine_kernel, relu=relu, has_res=has_res),
        out_shape=jax.ShapeDtypeStruct((Mp, Np), out_dtype),
        grid_spec=pltpu.PrefetchScalarGridSpec(
            num_scalar_prefetch=0,
            grid=grid,
            in_specs=in_specs,
            out_specs=pl.BlockSpec((tm, tn), lambda i, j, k: (i, j)),
            scratch_shapes=[pltpu.VMEM((tm, tn), jnp.float32)]),
        compiler_params=pltpu.CompilerParams(
            dimension_semantics=("parallel", "parallel", "arbitrary"),
            vmem_limit_bytes=_VMEM_LIMIT),
        cost_estimate=pl.CostEstimate(flops=2 * Mp * Np * K, transcendentals=0,
                                      bytes_accessed=int(bytes_io)),
    )(*args)
    if (Mp, Np) != (M, N):
        out = out[:M, :N]
    return out


def _conv3x3_kernel(x_ref, w_ref, scale_ref, shift_ref, o_ref, acc_ref, *, relu):
    """Direct 3x3 stride-1 conv: 9 shifted matmuls accumulated in a f32 VMEM scratch."""
    _, Hp, Wp, cin = x_ref.shape
    H, W = Hp - 2, Wp - 2
    tn = o_ref.shape[-1]
    acc_ref[...] = jnp.zeros_like(acc_ref)
    for i in range(3):
        for j in range(3):
            xs = x_ref[0, i:i + H, j:j + W, :].reshape(H * W, cin)
            acc_ref[...] += jnp.dot(xs, w_ref[i, j], preferred_element_type=jnp.float32)
    out = acc_ref[...] * scale_ref[...] + shift_ref[...]
    if relu:
        out = jnp.maximum(out, 0.0)
    o_ref[...] = out.reshape(1, H, W, tn).astype(o_ref.dtype)


def conv3x3_bn(x, w_conv, bn, *, relu):
    """3x3 conv (stride 1, pad 1, bias=False) + BN(eval) [+ ReLU] without im2col in HBM.

    x: (N, H, W, Cp) bf16/f32 with channel dim already lane-padded; w_conv: (Cout, Cin, 3, 3)."""
    N, H, W, Cp = x.shape
    Cout, Cin = w_conv.shape[0], w_conv.shape[1]
    Cout_p = _round_up(Cout, 128)
    scale, shift = _bn_scale_shift(bn)

    wt = jnp.transpose(w_conv, (2, 3, 1, 0))                               # (3, 3, Cin, Cout)
    wt = jnp.pad(wt, ((0, 0), (0, 0), (0, Cp - Cin), (0, Cout_p - Cout))).astype(jnp.bfloat16)
    scale_p = jnp.pad(scale, (0, Cout_p - Cout)).reshape(1, Cout_p).astype(jnp.float32)
    shift_p = jnp.pad(shift, (0, Cout_p - Cout)).reshape(1, Cout_p).astype(jnp.float32)
    xpad = jnp.pad(x, ((0, 0), (1, 1), (1, 1), (0, 0))).astype(jnp.bfloat16)

    tn = 256 if (Cout_p % 256 == 0) else 128
    grid = (N, Cout_p // tn)
    bytes_io = xpad.size * 2 + wt.size * 2 + N * H * W * Cout_p * 2
    return pl.pallas_call(
        functools.partial(_conv3x3_kernel, relu=relu),
        out_shape=jax.ShapeDtypeStruct((N, H, W, Cout_p), jnp.bfloat16),
        grid_spec=pltpu.PrefetchScalarGridSpec(
            num_scalar_prefetch=0,
            grid=grid,
            in_specs=[
                pl.BlockSpec((1, H + 2, W + 2, Cp), lambda n, j: (n, 0, 0, 0)),
                pl.BlockSpec((3, 3, Cp, tn), lambda n, j: (0, 0, 0, j)),
                pl.BlockSpec((1, tn), lambda n, j: (0, j)),
                pl.BlockSpec((1, tn), lambda n, j: (0, j)),
            ],
            out_specs=pl.BlockSpec((1, H, W, tn), lambda n, j: (n, 0, 0, j)),
            scratch_shapes=[pltpu.VMEM((H * W, tn), jnp.float32)]),
        compiler_params=pltpu.CompilerParams(
            dimension_semantics=("parallel", "parallel"),
            vmem_limit_bytes=_VMEM_LIMIT),
        cost_estimate=pl.CostEstimate(flops=2 * N * H * W * 9 * Cp * Cout_p,
                                      transcendentals=0, bytes_accessed=int(bytes_io)),
    )(xpad, wt, scale_p, shift_p)


def _attn_kernel(q_ref, k_ref, v_ref, o_ref, *, scale):
    """Single-query attention (Lq == 1). q: (BH, D), k/v: (BH, L, D) -> o: (BH, D)."""
    q = q_ref[...] * scale
    k = k_ref[...]
    v = v_ref[...]
    s = jnp.sum(q[:, None, :] * k, axis=-1)                  # (BH, L)
    s = s - jnp.max(s, axis=-1, keepdims=True)
    p = jnp.exp(s)
    denom = jnp.sum(p, axis=-1, keepdims=True)
    p = p * pl.reciprocal(denom, approx=True)                # EUP reciprocal
    o_ref[...] = jnp.sum(p[:, :, None] * v, axis=1)          # (BH, D)


def attention(q, k, v, scale):
    BH, D = q.shape
    _, L, _ = k.shape
    return pl.pallas_call(
        functools.partial(_attn_kernel, scale=scale),
        out_shape=jax.ShapeDtypeStruct((BH, D), jnp.float32),
        grid=(1,),
        in_specs=[pl.BlockSpec((BH, D), lambda i: (0, 0)),
                  pl.BlockSpec((BH, L, D), lambda i: (0, 0, 0)),
                  pl.BlockSpec((BH, L, D), lambda i: (0, 0, 0))],
        out_specs=pl.BlockSpec((BH, D), lambda i: (0, 0)),
        compiler_params=pltpu.CompilerParams(dimension_semantics=("arbitrary",),
                                             vmem_limit_bytes=_VMEM_LIMIT),
    )(q.astype(jnp.float32), k.astype(jnp.float32), v.astype(jnp.float32))


# ----------------------------- JAX glue (layout / conv wrappers) ------------

def im2col(x, k, stride, pad):
    """NHWC -> (N*Ho*Wo, k*k*C) patches (row order matches weights transposed to kh,kw,Cin,Cout)."""
    N, H, W, C = x.shape
    if pad:
        x = jnp.pad(x, ((0, 0), (pad, pad), (pad, pad), (0, 0)))
    Hp, Wp = x.shape[1], x.shape[2]
    Ho = (Hp - k) // stride + 1
    Wo = (Wp - k) // stride + 1
    cols = []
    for i in range(k):
        for j in range(k):
            cols.append(x[:, i:i + stride * Ho:stride, j:j + stride * Wo:stride, :])
    patches = jnp.concatenate(cols, axis=-1) if len(cols) > 1 else cols[0]
    return patches.reshape(N * Ho * Wo, k * k * C), (N, Ho, Wo)


def avg_pool(x, k):
    # TODO(synk): fuse the 2x2 average pool into the neighbouring conv kernels to remove this
    # extra HBM round trip; kept as a tiny plain-JAX reduction for now.
    N, H, W, C = x.shape
    y = x.reshape(N, H // k, k, W // k, k, C).astype(jnp.float32).mean(axis=(2, 4))
    return y.astype(x.dtype)


def conv1x1_bn(x, w_conv, bn, *, relu, residual=None):
    """1x1 conv + BN(eval) [+ residual] [+ ReLU] as one tiled Pallas matmul."""
    N, H, W, Cp = x.shape
    Cout, Cin = w_conv.shape[0], w_conv.shape[1]
    Cout_p = _round_up(Cout, 128)
    scale, shift = _bn_scale_shift(bn)
    wmat = jnp.pad(w_conv[:, :, 0, 0].T, ((0, Cp - Cin), (0, Cout_p - Cout)))
    scale_p = jnp.pad(scale, (0, Cout_p - Cout))
    shift_p = jnp.pad(shift, (0, Cout_p - Cout))
    a = x.reshape(N * H * W, Cp)
    res = residual.reshape(N * H * W, residual.shape[-1]) if residual is not None else None
    y = mm_affine(a, wmat, scale_p, shift_p, relu=relu, residual=res, out_dtype=jnp.bfloat16)
    return y.reshape(N, H, W, Cout_p)


def conv_im2col_bn(x, w_conv, bn, *, k, stride, pad, relu):
    """General conv (used only for the stride-2 stem conv1) via im2col + fused matmul."""
    # TODO(synk): the stride-2 stem conv still materializes im2col patches (K=27, 3 input
    # channels, negligible absolute size); a strided direct-conv kernel would remove it.
    Cout, Cin = w_conv.shape[0], w_conv.shape[1]
    Cout_p = _round_up(Cout, 128)
    scale, shift = _bn_scale_shift(bn)
    patches, (N, Ho, Wo) = im2col(x, k, stride, pad)
    wmat = jnp.transpose(w_conv, (2, 3, 1, 0)).reshape(k * k * Cin, Cout)
    wmat = jnp.pad(wmat, ((0, 0), (0, Cout_p - Cout)))
    scale_p = jnp.pad(scale, (0, Cout_p - Cout))
    shift_p = jnp.pad(shift, (0, Cout_p - Cout))
    y = mm_affine(patches, wmat, scale_p, shift_p, relu=relu, out_dtype=jnp.bfloat16)
    return y.reshape(N, Ho, Wo, Cout_p)


def linear(x2d, lin):
    n_out = lin['w'].shape[0]
    return mm_affine(x2d, lin['w'].T, jnp.ones((n_out,), jnp.float32), lin['b'],
                     relu=False, out_dtype=jnp.float32)


# ----------------------------- Parameter init ------------------------------

def _conv_init(key, cout, cin, k):
    fan_in = cin * k * k
    return jax.random.normal(key, (cout, cin, k, k), jnp.float32) / jnp.sqrt(fan_in)


def _bn_init(key, c):
    k1, k2 = jax.random.split(key)
    return dict(gamma=1.0 + 0.1 * jax.random.normal(k1, (c,), jnp.float32),
                beta=0.1 * jax.random.normal(k2, (c,), jnp.float32),
                mean=jnp.zeros((c,), jnp.float32),
                var=jnp.ones((c,), jnp.float32))


def _linear_init(key, cin, cout):
    k1, k2 = jax.random.split(key)
    return dict(w=jax.random.normal(k1, (cout, cin), jnp.float32) / jnp.sqrt(cin),
                b=0.01 * jax.random.normal(k2, (cout,), jnp.float32))


def _bottleneck_init(key, inplanes, planes, stride):
    keys = jax.random.split(key, 8)
    p = dict(
        stride=stride,
        conv1=_conv_init(keys[0], planes, inplanes, 1),
        bn1=_bn_init(keys[1], planes),
        conv2=_conv_init(keys[2], planes, planes, 3),
        bn2=_bn_init(keys[3], planes),
        conv3=_conv_init(keys[4], planes * 4, planes, 1),
        bn3=_bn_init(keys[5], planes * 4),
    )
    if stride > 1 or inplanes != planes * 4:
        p['down_conv'] = _conv_init(keys[6], planes * 4, inplanes, 1)
        p['down_bn'] = _bn_init(keys[7], planes * 4)
    return p


def init_modified_resnet(key, layers, output_dim, heads, input_resolution, width):
    keys = jax.random.split(key, 8)
    params = dict(
        conv1=_conv_init(keys[0], width // 2, 3, 3),
        bn1=_bn_init(keys[1], width // 2),
        conv2=_conv_init(keys[2], width // 2, width // 2, 3),
        bn2=_bn_init(keys[3], width // 2),
        conv3=_conv_init(keys[4], width, width // 2, 3),
        bn3=_bn_init(keys[5], width),
    )
    inplanes = width
    layer_params = []
    widths = (width, width * 2, width * 4, width * 8)
    strides = (1, 2, 2, 2)
    lkeys = jax.random.split(keys[6], sum(layers))
    idx = 0
    for planes, blocks, stride in zip(widths, layers, strides):
        blocks_p = [_bottleneck_init(lkeys[idx], inplanes, planes, stride)]
        idx += 1
        inplanes = planes * 4
        for _ in range(1, blocks):
            blocks_p.append(_bottleneck_init(lkeys[idx], inplanes, planes, 1))
            idx += 1
        layer_params.append(blocks_p)
    params['layers'] = layer_params

    embed_dim = width * 32
    spacial_dim = input_resolution // 32
    akeys = jax.random.split(keys[7], 5)
    params['attnpool'] = dict(
        pos=jax.random.normal(akeys[0], (spacial_dim ** 2 + 1, embed_dim), jnp.float32)
            / embed_dim ** 0.5,
        q=_linear_init(akeys[1], embed_dim, embed_dim),
        k=_linear_init(akeys[2], embed_dim, embed_dim),
        v=_linear_init(akeys[3], embed_dim, embed_dim),
        c=_linear_init(akeys[4], embed_dim, output_dim),
        heads=heads,
    )
    return params


# ----------------------------- Forward pass --------------------------------

def bottleneck_forward(x, p):
    stride = p['stride']
    out = conv1x1_bn(x, p['conv1'], p['bn1'], relu=True)
    out = conv3x3_bn(out, p['conv2'], p['bn2'], relu=True)
    if stride > 1:
        out = avg_pool(out, stride)
    if 'down_conv' in p:
        identity = avg_pool(x, stride) if stride > 1 else x
        identity = conv1x1_bn(identity, p['down_conv'], p['down_bn'], relu=False)
    else:
        identity = x
    # drop_path is the identity in eval mode.
    # conv3 + BN + residual add + ReLU fused into a single Pallas matmul epilogue.
    return conv1x1_bn(out, p['conv3'], p['bn3'], relu=True, residual=identity)


def attn_pool_forward(x, p):
    # x: (N, H, W, C) NHWC; PyTorch does flatten(2).permute(2,0,1) on NCHW == (HW, N, C)
    N, H, W, C = x.shape
    heads = p['heads']
    xf = x.astype(jnp.float32)
    seq = xf.reshape(N, H * W, C).transpose(1, 0, 2)          # (HW, N, C)
    seq = jnp.concatenate([seq.mean(axis=0, keepdims=True), seq], axis=0)
    seq = seq + p['pos'][:, None, :]
    L, B, E = seq.shape
    hd = E // heads

    q = linear(seq[0], p['q'])                                # (B, E)   (query = mean token)
    k = linear(seq.reshape(L * B, E), p['k']).reshape(L, B, E)
    v = linear(seq.reshape(L * B, E), p['v']).reshape(L, B, E)

    qh = q.reshape(B * heads, hd)
    kh = k.reshape(L, B * heads, hd).transpose(1, 0, 2)       # (B*heads, L, hd)
    vh = v.reshape(L, B * heads, hd).transpose(1, 0, 2)
    oh = attention(qh, kh, vh, scale=1.0 / float(hd) ** 0.5)  # (B*heads, hd)
    return linear(oh.reshape(B, E), p['c'])                   # (B, output_dim)


def modified_resnet_forward(x_nchw, params):
    # layout: input is NCHW (PyTorch convention); compute is done in NHWC with the channel dim
    # lane-padded to a multiple of 128 (padded channels stay exactly zero).
    x = jnp.transpose(x_nchw, (0, 2, 3, 1)).astype(jnp.float32)
    # stem
    x = conv_im2col_bn(x, params['conv1'], params['bn1'], k=3, stride=2, pad=1, relu=True)
    x = conv3x3_bn(x, params['conv2'], params['bn2'], relu=True)
    x = conv3x3_bn(x, params['conv3'], params['bn3'], relu=True)
    x = avg_pool(x, 2)
    # residual stages
    for blocks in params['layers']:
        for bp in blocks:
            x = bottleneck_forward(x, bp)
    # strip lane padding before the attention-pool head
    embed_dim = params['attnpool']['pos'].shape[1]
    x = x[..., :embed_dim]
    return attn_pool_forward(x, params['attnpool'])


# ----------------------------- Main -----------------------------------------

if __name__ == "__main__":
    key = jax.random.PRNGKey(0)
    pkey, xkey = jax.random.split(key)

    # Small configuration consistent with ModifiedResNet's constructor:
    layers = (1, 1, 1, 1)
    width = 8                 # stem: 3 -> 4 -> 4 -> 8 channels
    heads = 4                 # embed_dim = width*32 = 256, head_dim = 64
    output_dim = 16
    input_resolution = 32     # 32 / 32 = 1 -> attnpool spacial_dim = 1

    params = init_modified_resnet(pkey, layers, output_dim, heads, input_resolution, width)
    x = jax.random.normal(xkey, (2, 3, input_resolution, input_resolution), jnp.float32)

    out = modified_resnet_forward(x, params)
    out = jax.block_until_ready(out)
    assert out.shape == (2, output_dim), out.shape
    assert bool(jnp.all(jnp.isfinite(out)))
    print("KERNEL_OK")
</pallas_src>

<mosaic_0001>
module attributes {stable_mosaic.version = 11 : i64} {
  func.func @_mm_affine_kernel(%arg0: i32, %arg1: i32, %arg2: i32, %arg3: memref<512x27xbf16, #tpu.memory_space<vmem>>, %arg4: memref<27x128xbf16, #tpu.memory_space<vmem>>, %arg5: memref<1x128xf32, #tpu.memory_space<vmem>>, %arg6: memref<1x128xf32, #tpu.memory_space<vmem>>, %arg7: memref<512x128xbf16, #tpu.memory_space<vmem>>, %arg8: memref<512x128xf32, #tpu.memory_space<vmem>>) attributes {dimension_semantics = [#tpu.dimension_semantics<parallel>, #tpu.dimension_semantics<parallel>, #tpu.dimension_semantics<arbitrary>], iteration_bounds = array<i64: 1, 1, 1>, scalar_prefetch = 0 : i64, scratch_operands = 1 : i64, tpu.core_type = #tpu.core_type<tc>, window_params = [{transform_indices = @transform_0, window_bounds = array<i64: 512, 27>}, {transform_indices = @transform_1, window_bounds = array<i64: 27, 128>}, {transform_indices = @transform_2, window_bounds = array<i64: 1, 128>}, {transform_indices = @transform_3, window_bounds = array<i64: 1, 128>}, {transform_indices = @transform_4, window_bounds = array<i64: 512, 128>}]} {
    %c0_i32 = arith.constant 0 : i32
    %0 = arith.cmpi eq, %arg2, %c0_i32 : i32
    %1 = arith.extui %0 : i1 to i32
    %c0_i32_0 = arith.constant 0 : i32
    %2 = arith.cmpi ne, %1, %c0_i32_0 : i32
    scf.if %2 {
      %cst_10 = arith.constant 0.000000e+00 : f32
      %12 = vector.broadcast %cst_10 : f32 to vector<512x128xf32>
      %c0_11 = arith.constant 0 : index
      %c0_12 = arith.constant 0 : index
      %13 = vector.load %arg8[%c0_11, %c0_12] : memref<512x128xf32, #tpu.memory_space<vmem>>, vector<512x128xf32>
      tpu.vector_store %arg8[%c0_11, %c0_12], %12 {strides = array<i32>} : memref<512x128xf32, #tpu.memory_space<vmem>>, vector<512x128xf32>,
    } else {
    }
    %c0 = arith.constant 0 : index
    %c0_1 = arith.constant 0 : index
    %3 = vector.load %arg8[%c0, %c0_1] : memref<512x128xf32, #tpu.memory_space<vmem>>, vector<512x128xf32>
    %c0_2 = arith.constant 0 : index
    %c0_3 = arith.constant 0 : index
    %4 = vector.load %arg3[%c0_2, %c0_3] : memref<512x27xbf16, #tpu.memory_space<vmem>>, vector<512x27xbf16>
    %c0_4 = arith.constant 0 : index
    %c0_5 = arith.constant 0 : index
    %5 = vector.load %arg4[%c0_4, %c0_5] : memref<27x128xbf16, #tpu.memory_space<vmem>>, vector<27x128xbf16>
    %cst = arith.constant dense<0.000000e+00> : vector<512x128xf32>
    %6 = tpu.matmul %4, %5, %cst {dimension_numbers = #tpu.dot_dimension_numbers<[1], [0], [0], [1], [0, 0, 1, 1], [], []>} : vector<512x27xbf16>, vector<27x128xbf16>, vector<512x128xf32> -> vector<512x128xf32>
    %7 = arith.addf %3, %6 : vector<512x128xf32>
    %c0_6 = arith.constant 0 : index
    %c0_7 = arith.constant 0 : index
    %8 = vector.load %arg8[%c0_6, %c0_7] : memref<512x128xf32, #tpu.memory_space<vmem>>, vector<512x128xf32>
    tpu.vector_store %arg8[%c0_6, %c0_7], %7 {strides = array<i32>} : memref<512x128xf32, #tpu.memory_space<vmem>>, vector<512x128xf32>,
    %c0_i32_8 = arith.constant 0 : i32
    %9 = arith.cmpi eq, %arg2, %c0_i32_8 : i32
    %10 = arith.extui %9 : i1 to i32
    %c0_i32_9 = arith.constant 0 : i32
    %11 = arith.cmpi ne, %10, %c0_i32_9 : i32
    scf.if %11 {
      %c0_10 = arith.constant 0 : index
      %c0_11 = arith.constant 0 : index
      %12 = vector.load %arg8[%c0_10, %c0_11] : memref<512x128xf32, #tpu.memory_space<vmem>>, vector<512x128xf32>
      %c0_12 = arith.constant 0 : index
      %c0_13 = arith.constant 0 : index
      %13 = vector.load %arg5[%c0_12, %c0_13] : memref<1x128xf32, #tpu.memory_space<vmem>>, vector<1x128xf32>
      %14 = vector.broadcast %13 : vector<1x128xf32> to vector<512x128xf32>
      %15 = arith.mulf %12, %14 : vector<512x128xf32>
      %c0_14 = arith.constant 0 : index
      %c0_15 = arith.constant 0 : index
      %16 = vector.load %arg6[%c0_14, %c0_15] : memref<1x128xf32, #tpu.memory_space<vmem>>, vector<1x128xf32>
      %17 = vector.broadcast %16 : vector<1x128xf32> to vector<512x128xf32>
      %18 = arith.addf %15, %17 : vector<512x128xf32>
      %cst_16 = arith.constant 0.000000e+00 : f32
      %19 = vector.broadcast %cst_16 : f32 to vector<512x128xf32>
      %20 = arith.maximumf %18, %19 : vector<512x128xf32>
      %21 = arith.truncf %20 : vector<512x128xf32> to vector<512x128xbf16>
      %c0_17 = arith.constant 0 : index
      %c0_18 = arith.constant 0 : index
      %22 = vector.load %arg7[%c0_17, %c0_18] : memref<512x128xbf16, #tpu.memory_space<vmem>>, vector<512x128xbf16>
      tpu.vector_store %arg7[%c0_17, %c0_18], %21 {strides = array<i32>} : memref<512x128xbf16, #tpu.memory_space<vmem>>, vector<512x128xbf16>,
    } else {
    }
    return
  }
  func.func @transform_0(%arg0: i32, %arg1: i32, %arg2: i32) -> (i32, i32) {
    %c0_i32 = arith.constant 0 : i32
    return %arg0, %arg2 : i32, i32
  }
  func.func @transform_1(%arg0: i32, %arg1: i32, %arg2: i32) -> (i32, i32) {
    %c0_i32 = arith.constant 0 : i32
    return %arg2, %arg1 : i32, i32
  }
  func.func @transform_2(%arg0: i32, %arg1: i32, %arg2: i32) -> (i32, i32) {
    %c0_i32 = arith.constant 0 : i32
    %c0_i32_0 = arith.constant 0 : i32
    return %c0_i32, %arg1 : i32, i32
  }
  func.func @transform_3(%arg0: i32, %arg1: i32, %arg2: i32) -> (i32, i32) {
    %c0_i32 = arith.constant 0 : i32
    %c0_i32_0 = arith.constant 0 : i32
    return %c0_i32, %arg1 : i32, i32
  }
  func.func @transform_4(%arg0: i32, %arg1: i32, %arg2: i32) -> (i32, i32) {
    %c0_i32 = arith.constant 0 : i32
    return %arg0, %arg1 : i32, i32
  }
}

</mosaic_0001>

<bundles_post_ra>
// kernel: tpu_custom_call.1
= control target key start
LH: loop header
LB: loop body
LE: loop exit
PB: predicated region body
PF: predicated region fallthrough
CT: control target
= control target key end

     0   :  { %vm487_vm0 = vcmask 1044480   ;;  %vm488_vm1 = vcmask 1045504   ;;  %v2075_v2 = vmov 65535   ;;  %vm390_vm2 = vcmask 220160   ;;  %s2388_s0 = inlined_call_operand.vmem [shape: bf16[512,27], index: 0, kind: input, shape index: {}]   ;;  %s2389_s1 = inlined_call_operand.vmem [shape: bf16[27,128], index: 1, kind: input, shape index: {}]   ;;  %s2390_s2 = inlined_call_operand.vmem [shape: f32[1,128], index: 2, kind: input, shape index: {}]   ;;  %s2391_s3 = inlined_call_operand.vmem [shape: f32[1,128], index: 3, kind: input, shape index: {}]   ;;  %s2392_s4 = inlined_call_operand.hbm [shape: bf16[512,128], index: 4, kind: output, shape index: {}]  }
   0x1   :  { %v2017_v0 = vld [vmem:[%s2389_s1] sm:$0xff]   ;;  %v2018_v1 = vld [vmem:[%s2389_s1 + $0x8] sm:$0x3f]   ;;  %v489_v3 = vsel %vm487_vm0, 4294967295, %v2075_v2  ;;  %v2023_v10 = vld [vmem:[%s2388_s0 + $0x10] sm:$0xff]  }
   0x2   :  { %1941 = vmatprep.subr.bf16.mxu0 %v2017_v0  ;;  %2009 = vmatprep.subr.bf16.mxu1 %v2017_v0  ;;  %v2019_v4 = vld [vmem:[%s2388_s0] sm:$0xff]   ;;  %v490_v6 = vsel %vm488_vm1, %v489_v3, 0  ;;  %v2021_v8 = vld [vmem:[%s2388_s0 + $0x8] sm:$0xff]   ;;  %v2024_v11 = vld [vmem:[%s2388_s0 + $0x90] sm:$0xff]  }
   0x3   :  { %1942 = vmatpush3.bf16.msra.mxu0 %v2017_v0  ;;  %2011 = vmatpush3.bf16.msra.mxu1 %v2017_v0  ;;  %v2020_v5 = vld [vmem:[%s2388_s0 + $0x80] sm:$0xff]   ;;  %v492_v7 = vand.u32 %v2018_v1, %v490_v6  ;;  %v2022_v9 = vld [vmem:[%s2388_s0 + $0x88] sm:$0xff]   ;;  %v2025_v12 = vld [vmem:[%s2388_s0 + $0x18] sm:$0xff]  }
   0x4   :  { %1945 = vmatprep.mubr.msk.bf16.mxu0 %vm390_vm2, %v2019_v4  ;;  %1977 = vmatprep.mubr.msk.bf16.mxu1 %vm390_vm2, %v2020_v5  ;;  %v2026_v13 = vld [vmem:[%s2388_s0 + $0x98] sm:$0xff]   ;;  %v2027_v14 = vld [vmem:[%s2388_s0 + $0x20] sm:$0xff]   ;;  %v2029_v16 = vld [vmem:[%s2388_s0 + $0x28] sm:$0xff]  }
   0x5   :  { %1943 = vmatprep.subr.bf16.mxu0 %v492_v7  ;;  %2010 = vmatprep.subr.bf16.mxu1 %v492_v7  ;;  %v2028_v15 = vld [vmem:[%s2388_s0 + $0xa0] sm:$0xff]   ;;  %v2030_v17 = vld [vmem:[%s2388_s0 + $0xa8] sm:$0xff]   ;;  %v2031_v18 = vld [vmem:[%s2388_s0 + $0x30] sm:$0xff]  }
   0x6   :  { %v2032_v19 = vld [vmem:[%s2388_s0 + $0xb0] sm:$0xff]   ;;  %v2033_v20 = vld [vmem:[%s2388_s0 + $0x38] sm:$0xff]   ;;  %v2035_v22 = vld [vmem:[%s2388_s0 + $0x40] sm:$0xff]  }
   0x7   :  { %1944 = vmatpush3.bf16.msra.mxu0 %v492_v7  ;;  %2012 = vmatpush3.bf16.msra.mxu1 %v492_v7  ;;  %v2034_v21 = vld [vmem:[%s2388_s0 + $0xb8] sm:$0xff]   ;;  %v2036_v23 = vld [vmem:[%s2388_s0 + $0xc0] sm:$0xff]  }
   0xa   :  { %1946 = vmatmul.mubr.msk.bf16.vlgmr.msra.gmra.mrb[0].mxu0 %vm390_vm2, %v2021_v8  ;;  %1978 = vmatmul.mubr.msk.bf16.vlgmr.msra.gmra.mrb[0].mxu1 %vm390_vm2, %v2022_v9 }
   0xb   :  { %1949 = vmatprep.mubr.msk.bf16.mxu0 %vm390_vm2, %v2023_v10  ;;  %1981 = vmatprep.mubr.msk.bf16.mxu1 %vm390_vm2, %v2024_v11 }
  0x12   :  { %1950 = vmatmul.mubr.msk.bf16.gmra.mrb[4].mxu0 %vm390_vm2, %v2025_v12  ;;  %1982 = vmatmul.mubr.msk.bf16.gmra.mrb[4].mxu1 %vm390_vm2, %v2026_v13 }
  0x13   :  { %1953 = vmatprep.mubr.msk.bf16.mxu0 %vm390_vm2, %v2027_v14  ;;  %1985 = vmatprep.mubr.msk.bf16.mxu1 %vm390_vm2, %v2028_v15 }
  0x1a   :  { %1954 = vmatmul.mubr.msk.bf16.gmra.mrb[8].mxu0 %vm390_vm2, %v2029_v16  ;;  %1986 = vmatmul.mubr.msk.bf16.gmra.mrb[8].mxu1 %vm390_vm2, %v2030_v17 }
  0x1b   :  { %1957 = vmatprep.mubr.msk.bf16.mxu0 %vm390_vm2, %v2031_v18  ;;  %1989 = vmatprep.mubr.msk.bf16.mxu1 %vm390_vm2, %v2032_v19 }
  0x1c   :  { %9 = vsyncpa [#allocation4], 0  ;;  %v2037_v24 = vld [vmem:[%s2388_s0 + $0x48] sm:$0xff]   ;;  %v2039_v26 = vld [vmem:[%s2388_s0 + $0x50] sm:$0xff]  }
  0x1d   :  { %v2038_v25 = vld [vmem:[%s2388_s0 + $0xc8] sm:$0xff]   ;;  %v2040_v27 = vld [vmem:[%s2388_s0 + $0xd0] sm:$0xff]   ;;  %v2041_v28 = vld [vmem:[%s2388_s0 + $0x58] sm:$0xff]  }
  0x1e   :  { %v2042_v29 = vld [vmem:[%s2388_s0 + $0xd8] sm:$0xff]   ;;  %v2043_v30 = vld [vmem:[%s2388_s0 + $0x60] sm:$0xff]   ;;  %v2045_v32 = vld [vmem:[%s2388_s0 + $0x68] sm:$0xff]  }
  0x1f   :  { %v2044_v31 = vld [vmem:[%s2388_s0 + $0xe0] sm:$0xff]   ;;  %v2046_v33 = vld [vmem:[%s2388_s0 + $0xe8] sm:$0xff]   ;;  %v2047_v34 = vld [vmem:[%s2388_s0 + $0x70] sm:$0xff]  }
  0x20   :  { %v2048_v35 = vld [vmem:[%s2388_s0 + $0xf0] sm:$0xff]   ;;  %v2049_v36 = vld [vmem:[%s2388_s0 + $0x78] sm:$0xff]   ;;  %v2241_v38 = vld [vmem:[%s2390_s2] ss:$0 sm:$0xff] }
  0x21   :  { %v2050_v37 = vld [vmem:[%s2388_s0 + $0xf8] sm:$0xff]   ;;  %v2246_v40 = vld [vmem:[%s2391_s3] ss:$0 sm:$0xff]  ;;  %s2076_s0 = smov [#allocation3]  }
  0x22   :  { %1958 = vmatmul.mubr.msk.bf16.gmra.mrb[12].mxu0 %vm390_vm2, %v2033_v20  ;;  %1990 = vmatmul.mubr.msk.bf16.gmra.mrb[12].mxu1 %vm390_vm2, %v2034_v21  ;;  %s1509_s2 = sshll.u32 %s2076_s0, 4  ;;  %s1510_s2 = int_to_ptr.vmem [resolvable:$true] %s1509_s2 }
  0x23   :  { %1961 = vmatprep.mubr.msk.bf16.mxu0 %vm390_vm2, %v2035_v22  ;;  %1993 = vmatprep.mubr.msk.bf16.mxu1 %vm390_vm2, %v2036_v23  ;;  %s2051_s3 = scalar_lea.vmem %s1510_s2, 4096  ;;  %p2056_p1 = scmp.lt.s32.totalorder %s1510_s2, %s1510_s2 }
  0x24   :  { %p2052_p0 = scmp.ne.s32.totalorder %s1510_s2, %s2051_s3  ;;  %p2057_p2 = scmp.lt.s32.totalorder %s2051_s3, %s2051_s3 }
  0x26   :  { %p2058_p3 = por %p2057_p2, %p2056_p1 }
  0x28   :  { %p2059_p4 = pnand %p2058_p3, %p2052_p0 }
  0x2a   :  { %1962 = vmatmul.mubr.msk.bf16.gmra.mrb[16].mxu0 %vm390_vm2, %v2037_v24  ;;  %1994 = vmatmul.mubr.msk.bf16.gmra.mrb[16].mxu1 %vm390_vm2, %v2038_v25 }
  0x2b   :  { %1965 = vmatprep.mubr.msk.bf16.mxu0 %vm390_vm2, %v2039_v26  ;;  %1997 = vmatprep.mubr.msk.bf16.mxu1 %vm390_vm2, %v2040_v27 }
  0x32   :  { %1966 = vmatmul.mubr.msk.bf16.gmra.mrb[20].mxu0 %vm390_vm2, %v2041_v28  ;;  %1998 = vmatmul.mubr.msk.bf16.gmra.mrb[20].mxu1 %vm390_vm2, %v2042_v29 }
  0x33   :  { %1969 = vmatprep.mubr.msk.bf16.mxu0 %vm390_vm2, %v2043_v30  ;;  %2001 = vmatprep.mubr.msk.bf16.mxu1 %vm390_vm2, %v2044_v31 }
  0x3a   :  { %1970 = vmatmul.mubr.msk.bf16.gmra.mrb[24].mxu0 %vm390_vm2, %v2045_v32  ;;  %2002 = vmatmul.mubr.msk.bf16.gmra.mrb[24].mxu1 %vm390_vm2, %v2046_v33 }
  0x3b   :  { %1973 = vmatprep.mubr.msk.bf16.mxu0 %vm390_vm2, %v2047_v34  ;;  %2005 = vmatprep.mubr.msk.bf16.mxu1 %vm390_vm2, %v2048_v35 }
  0x42   :  { %1974 = vmatmul.mubr.msk.bf16.gmra.mrb[28].mxu0 %vm390_vm2, %v2049_v36  ;;  %2006 = vmatmul.mubr.msk.bf16.gmra.mrb[28].mxu1 %vm390_vm2, %v2050_v37 }
  0xdd   :  { %v1947_v39 = vpop.f32.mrb[0].mxu0  ;;  %v1979_v41 = vpop.f32.mrb[0].mxu1 }
  0xde   :  { %v987_v42 = vmul.f32 %v1947_v39, %v2241_v38  ;;  %v1019_v43 = vmul.f32 %v1979_v41, %v2241_v38  ;;  %v528_v44 = vpop.f32.mrb[1].mxu0  ;;  %v656_v45 = vpop.f32.mrb[1].mxu1 }
  0xdf   :  { %v985_v46 = vmul.f32 %v2241_v38, %v528_v44  ;;  %v1017_v47 = vmul.f32 %v2241_v38, %v656_v45  ;;  %v1948_v48 = vpop.f32.mrb[2].mxu0  ;;  %v1980_v49 = vpop.f32.mrb[2].mxu1 }
  0xe0   :  { %v1058_v50 = vadd.f32 %v2246_v40, %v987_v42  ;;  %v1090_v51 = vadd.f32 %v2246_v40, %v1019_v43  ;;  %v988_v52 = vmul.f32 %v1948_v48, %v2241_v38  ;;  %v1020_v53 = vmul.f32 %v1980_v49, %v2241_v38  ;;  %v531_v54 = vpop.f32.mrb[3].mxu0  ;;  %v659_v55 = vpop.f32.mrb[3].mxu1 }
  0xe1   :  { %v1056_v56 = vadd.f32 %v2246_v40, %v985_v46  ;;  %v1088_v57 = vadd.f32 %v2246_v40, %v1017_v47  ;;  %v986_v58 = vmul.f32 %v2241_v38, %v531_v54  ;;  %v1018_v59 = vmul.f32 %v2241_v38, %v659_v55 }
  0xe2   :  { %v1059_v60 = vadd.f32 %v2246_v40, %v988_v52  ;;  %v1091_v61 = vadd.f32 %v2246_v40, %v1020_v53  ;;  %v1122_v0 = vmax.f32 %v1058_v50, 0.0  ;;  %v1154_v1 = vmax.f32 %v1090_v51, 0.0 }
  0xe3   :  { %v1057_v62 = vadd.f32 %v2246_v40, %v986_v58  ;;  %v1089_v63 = vadd.f32 %v2246_v40, %v1018_v59  ;;  %v1120_v4 = vmax.f32 %v1056_v56, 0.0  ;;  %v1152_v5 = vmax.f32 %v1088_v57, 0.0 }
  0xe4   :  { %v1123_v2 = vmax.f32 %v1059_v60, 0.0  ;;  %v1155_v3 = vmax.f32 %v1091_v61, 0.0 }
  0xe5   :  { %v1121_v6 = vmax.f32 %v1057_v62, 0.0  ;;  %v1153_v7 = vmax.f32 %v1089_v63, 0.0  ;;  %v1951_v8 = vpop.f32.mrb[4].mxu0  ;;  %v1983_v9 = vpop.f32.mrb[4].mxu1 }
  0xe6   :  { %v1724_v10 = vpack.c.bf16 %v1123_v2, %v1122_v0  ;;  %v1804_v11 = vpack.c.bf16 %v1155_v3, %v1154_v1  ;;  %v991_v12 = vmul.f32 %v1951_v8, %v2241_v38  ;;  %v1023_v13 = vmul.f32 %v1983_v9, %v2241_v38  ;;  %v544_v14 = vpop.f32.mrb[5].mxu0  ;;  %v672_v15 = vpop.f32.mrb[5].mxu1 }
  0xe7   :  { %v1719_v16 = vpack.c.bf16 %v1121_v6, %v1120_v4  ;;  %v1799_v17 = vpack.c.bf16 %v1153_v7, %v1152_v5  ;;  %v989_v18 = vmul.f32 %v2241_v38, %v544_v14  ;;  %v1021_v19 = vmul.f32 %v2241_v38, %v672_v15  ;;  %v1952_v20 = vpop.f32.mrb[6].mxu0  ;;  %v1984_v21 = vpop.f32.mrb[6].mxu1 }
  0xe8   :  { %1876 = vst [vmem:[#allocation3 + $0x8] sm:$0xff] %v1724_v10   ;;  %1892 = vst [vmem:[#allocation3 + $0x88] sm:$0xff] %v1804_v11   ;;  %v1062_v22 = vadd.f32 %v2246_v40, %v991_v12  ;;  %v1094_v23 = vadd.f32 %v2246_v40, %v1023_v13  ;;  %v992_v24 = vmul.f32 %v1952_v20, %v2241_v38  ;;  %v547_v26 = vpop.f32.mrb[7].mxu0  ;;  %v675_v27 = vpop.f32.mrb[7].mxu1 }
  0xe9   :  { %v1024_v25 = vmul.f32 %v1984_v21, %v2241_v38  ;;  %1720 = vst [vmem:[#allocation3] sm:$0xff] %v1719_v16   ;;  %1891 = vst [vmem:[#allocation3 + $0x80] sm:$0xff] %v1799_v17   ;;  %v1060_v28 = vadd.f32 %v2246_v40, %v989_v18  ;;  %v1092_v29 = vadd.f32 %v2246_v40, %v1021_v19 }
  0xea   :  { %v990_v30 = vmul.f32 %v2241_v38, %v547_v26  ;;  %v1022_v31 = vmul.f32 %v2241_v38, %v675_v27  ;;  %v1063_v32 = vadd.f32 %v2246_v40, %v992_v24  ;;  %v1126_v36 = vmax.f32 %v1062_v22, 0.0 }
  0xeb   :  { %v1095_v33 = vadd.f32 %v2246_v40, %v1024_v25  ;;  %v1158_v37 = vmax.f32 %v1094_v23, 0.0  ;;  %v1124_v42 = vmax.f32 %v1060_v28, 0.0  ;;  %v1156_v43 = vmax.f32 %v1092_v29, 0.0 }
  0xec   :  { %v1061_v34 = vadd.f32 %v2246_v40, %v990_v30  ;;  %v1093_v35 = vadd.f32 %v2246_v40, %v1022_v31  ;;  %v1127_v39 = vmax.f32 %v1063_v32, 0.0 }
  0xed   :  { %v1159_v41 = vmax.f32 %v1095_v33, 0.0  ;;  %v1955_v46 = vpop.f32.mrb[8].mxu0  ;;  %v1987_v47 = vpop.f32.mrb[8].mxu1 }
  0xee   :  { %v1125_v44 = vmax.f32 %v1061_v34, 0.0  ;;  %v1157_v45 = vmax.f32 %v1093_v35, 0.0  ;;  %v1734_v48 = vpack.c.bf16 %v1127_v39, %v1126_v36  ;;  %v995_v50 = vmul.f32 %v1955_v46, %v2241_v38  ;;  %v560_v52 = vpop.f32.mrb[9].mxu0  ;;  %v688_v53 = vpop.f32.mrb[9].mxu1 }
  0xef   :  { %v1814_v49 = vpack.c.bf16 %v1159_v41, %v1158_v37  ;;  %v1027_v51 = vmul.f32 %v1987_v47, %v2241_v38  ;;  %v993_v56 = vmul.f32 %v2241_v38, %v560_v52  ;;  %v1025_v57 = vmul.f32 %v2241_v38, %v688_v53  ;;  %v1956_v58 = vpop.f32.mrb[10].mxu0  ;;  %v1988_v59 = vpop.f32.mrb[10].mxu1 }
  0xf0   :  { %v1729_v54 = vpack.c.bf16 %v1125_v44, %v1124_v42  ;;  %v1809_v55 = vpack.c.bf16 %v1157_v45, %v1156_v43  ;;  %1878 = vst [vmem:[#allocation3 + $0x18] sm:$0xff] %v1734_v48   ;;  %v1066_v60 = vadd.f32 %v2246_v40, %v995_v50  ;;  %v996_v62 = vmul.f32 %v1956_v58, %v2241_v38  ;;  %v563_v0 = vpop.f32.mrb[11].mxu0  ;;  %v691_v1 = vpop.f32.mrb[11].mxu1 }
  0xf1   :  { %1894 = vst [vmem:[#allocation3 + $0x98] sm:$0xff] %v1814_v49   ;;  %v1098_v61 = vadd.f32 %v2246_v40, %v1027_v51  ;;  %v1028_v63 = vmul.f32 %v1988_v59, %v2241_v38  ;;  %v1064_v2 = vadd.f32 %v2246_v40, %v993_v56  ;;  %v1096_v3 = vadd.f32 %v2246_v40, %v1025_v57 }
  0xf2   :  { %1877 = vst [vmem:[#allocation3 + $0x10] sm:$0xff] %v1729_v54   ;;  %1893 = vst [vmem:[#allocation3 + $0x90] sm:$0xff] %v1809_v55   ;;  %v994_v4 = vmul.f32 %v2241_v38, %v563_v0  ;;  %v1026_v5 = vmul.f32 %v2241_v38, %v691_v1  ;;  %v1067_v6 = vadd.f32 %v2246_v40, %v996_v62  ;;  %v1130_v10 = vmax.f32 %v1066_v60, 0.0 }
  0xf3   :  { %v1099_v7 = vadd.f32 %v2246_v40, %v1028_v63  ;;  %v1162_v11 = vmax.f32 %v1098_v61, 0.0  ;;  %v1128_v14 = vmax.f32 %v1064_v2, 0.0  ;;  %v1160_v15 = vmax.f32 %v1096_v3, 0.0 }
  0xf4   :  { %v1065_v8 = vadd.f32 %v2246_v40, %v994_v4  ;;  %v1097_v9 = vadd.f32 %v2246_v40, %v1026_v5  ;;  %v1131_v12 = vmax.f32 %v1067_v6, 0.0 }
  0xf5   :  { %v1163_v13 = vmax.f32 %v1099_v7, 0.0  ;;  %v1959_v18 = vpop.f32.mrb[12].mxu0  ;;  %v1991_v19 = vpop.f32.mrb[12].mxu1 }
  0xf6   :  { %v1129_v16 = vmax.f32 %v1065_v8, 0.0  ;;  %v1161_v17 = vmax.f32 %v1097_v9, 0.0  ;;  %v1744_v20 = vpack.c.bf16 %v1131_v12, %v1130_v10  ;;  %v999_v22 = vmul.f32 %v1959_v18, %v2241_v38  ;;  %v576_v24 = vpop.f32.mrb[13].mxu0  ;;  %v704_v25 = vpop.f32.mrb[13].mxu1 }
  0xf7   :  { %v1824_v21 = vpack.c.bf16 %v1163_v13, %v1162_v11  ;;  %v1031_v23 = vmul.f32 %v1991_v19, %v2241_v38  ;;  %v997_v28 = vmul.f32 %v2241_v38, %v576_v24  ;;  %v1029_v29 = vmul.f32 %v2241_v38, %v704_v25  ;;  %v1960_v30 = vpop.f32.mrb[14].mxu0  ;;  %v1992_v31 = vpop.f32.mrb[14].mxu1 }
  0xf8   :  { %v1739_v26 = vpack.c.bf16 %v1129_v16, %v1128_v14  ;;  %v1819_v27 = vpack.c.bf16 %v1161_v17, %v1160_v15  ;;  %1880 = vst [vmem:[#allocation3 + $0x28] sm:$0xff] %v1744_v20   ;;  %v1070_v32 = vadd.f32 %v2246_v40, %v999_v22  ;;  %v1000_v34 = vmul.f32 %v1960_v30, %v2241_v38  ;;  %v579_v36 = vpop.f32.mrb[15].mxu0  ;;  %v707_v37 = vpop.f32.mrb[15].mxu1 }
  0xf9   :  { %1896 = vst [vmem:[#allocation3 + $0xa8] sm:$0xff] %v1824_v21   ;;  %v1102_v33 = vadd.f32 %v2246_v40, %v1031_v23  ;;  %v1032_v35 = vmul.f32 %v1992_v31, %v2241_v38  ;;  %v1068_v39 = vadd.f32 %v2246_v40, %v997_v28  ;;  %v1100_v41 = vadd.f32 %v2246_v40, %v1029_v29 }
  0xfa   :  { %1879 = vst [vmem:[#allocation3 + $0x20] sm:$0xff] %v1739_v26   ;;  %1895 = vst [vmem:[#allocation3 + $0xa0] sm:$0xff] %v1819_v27   ;;  %v998_v42 = vmul.f32 %v2241_v38, %v579_v36  ;;  %v1030_v43 = vmul.f32 %v2241_v38, %v707_v37  ;;  %v1071_v44 = vadd.f32 %v2246_v40, %v1000_v34  ;;  %v1134_v48 = vmax.f32 %v1070_v32, 0.0 }
  0xfb   :  { %v1103_v45 = vadd.f32 %v2246_v40, %v1032_v35  ;;  %v1166_v49 = vmax.f32 %v1102_v33, 0.0  ;;  %v1132_v52 = vmax.f32 %v1068_v39, 0.0  ;;  %v1164_v53 = vmax.f32 %v1100_v41, 0.0 }
  0xfc   :  { %v1069_v46 = vadd.f32 %v2246_v40, %v998_v42  ;;  %v1101_v47 = vadd.f32 %v2246_v40, %v1030_v43  ;;  %v1135_v50 = vmax.f32 %v1071_v44, 0.0 }
  0xfd   :  { %v1167_v51 = vmax.f32 %v1103_v45, 0.0  ;;  %v1963_v56 = vpop.f32.mrb[16].mxu0  ;;  %v1995_v57 = vpop.f32.mrb[16].mxu1 }
  0xfe   :  { %v1133_v54 = vmax.f32 %v1069_v46, 0.0  ;;  %v1165_v55 = vmax.f32 %v1101_v47, 0.0  ;;  %v1754_v58 = vpack.c.bf16 %v1135_v50, %v1134_v48  ;;  %v1003_v60 = vmul.f32 %v1963_v56, %v2241_v38  ;;  %v592_v62 = vpop.f32.mrb[17].mxu0  ;;  %v720_v63 = vpop.f32.mrb[17].mxu1 }
  0xff   :  { %v1834_v59 = vpack.c.bf16 %v1167_v51, %v1166_v49  ;;  %v1035_v61 = vmul.f32 %v1995_v57, %v2241_v38  ;;  %v1001_v2 = vmul.f32 %v2241_v38, %v592_v62  ;;  %v1033_v3 = vmul.f32 %v2241_v38, %v720_v63  ;;  %v1964_v4 = vpop.f32.mrb[18].mxu0  ;;  %v1996_v5 = vpop.f32.mrb[18].mxu1 }
 0x100   :  { %v1749_v0 = vpack.c.bf16 %v1133_v54, %v1132_v52  ;;  %v1829_v1 = vpack.c.bf16 %v1165_v55, %v1164_v53  ;;  %1882 = vst [vmem:[#allocation3 + $0x38] sm:$0xff] %v1754_v58   ;;  %v1074_v6 = vadd.f32 %v2246_v40, %v1003_v60  ;;  %v1004_v8 = vmul.f32 %v1964_v4, %v2241_v38  ;;  %v595_v10 = vpop.f32.mrb[19].mxu0  ;;  %v723_v11 = vpop.f32.mrb[19].mxu1 }
 0x101   :  { %1898 = vst [vmem:[#allocation3 + $0xb8] sm:$0xff] %v1834_v59   ;;  %v1106_v7 = vadd.f32 %v2246_v40, %v1035_v61  ;;  %v1036_v9 = vmul.f32 %v1996_v5, %v2241_v38  ;;  %v1072_v12 = vadd.f32 %v2246_v40, %v1001_v2  ;;  %v1104_v13 = vadd.f32 %v2246_v40, %v1033_v3 }
 0x102   :  { %1881 = vst [vmem:[#allocation3 + $0x30] sm:$0xff] %v1749_v0   ;;  %1897 = vst [vmem:[#allocation3 + $0xb0] sm:$0xff] %v1829_v1   ;;  %v1002_v14 = vmul.f32 %v2241_v38, %v595_v10  ;;  %v1034_v15 = vmul.f32 %v2241_v38, %v723_v11  ;;  %v1075_v16 = vadd.f32 %v2246_v40, %v1004_v8  ;;  %v1138_v20 = vmax.f32 %v1074_v6, 0.0 }
 0x103   :  { %v1107_v17 = vadd.f32 %v2246_v40, %v1036_v9  ;;  %v1170_v21 = vmax.f32 %v1106_v7, 0.0  ;;  %v1136_v24 = vmax.f32 %v1072_v12, 0.0  ;;  %v1168_v25 = vmax.f32 %v1104_v13, 0.0 }
 0x104   :  { %v1073_v18 = vadd.f32 %v2246_v40, %v1002_v14  ;;  %v1105_v19 = vadd.f32 %v2246_v40, %v1034_v15  ;;  %v1139_v22 = vmax.f32 %v1075_v16, 0.0 }
 0x105   :  { %v1171_v23 = vmax.f32 %v1107_v17, 0.0  ;;  %v1967_v28 = vpop.f32.mrb[20].mxu0  ;;  %v1999_v29 = vpop.f32.mrb[20].mxu1 }
 0x106   :  { %v1137_v26 = vmax.f32 %v1073_v18, 0.0  ;;  %v1169_v27 = vmax.f32 %v1105_v19, 0.0  ;;  %v1764_v30 = vpack.c.bf16 %v1139_v22, %v1138_v20  ;;  %v1007_v32 = vmul.f32 %v1967_v28, %v2241_v38  ;;  %v608_v34 = vpop.f32.mrb[21].mxu0  ;;  %v736_v35 = vpop.f32.mrb[21].mxu1 }
 0x107   :  { %v1844_v31 = vpack.c.bf16 %v1171_v23, %v1170_v21  ;;  %v1039_v33 = vmul.f32 %v1999_v29, %v2241_v38  ;;  %v1005_v39 = vmul.f32 %v2241_v38, %v608_v34  ;;  %v1037_v41 = vmul.f32 %v2241_v38, %v736_v35  ;;  %v1968_v42 = vpop.f32.mrb[22].mxu0  ;;  %v2000_v43 = vpop.f32.mrb[22].mxu1 }
 0x108   :  { %v1759_v36 = vpack.c.bf16 %v1137_v26, %v1136_v24  ;;  %v1839_v37 = vpack.c.bf16 %v1169_v27, %v1168_v25  ;;  %1884 = vst [vmem:[#allocation3 + $0x48] sm:$0xff] %v1764_v30   ;;  %v1078_v44 = vadd.f32 %v2246_v40, %v1007_v32  ;;  %v1008_v46 = vmul.f32 %v1968_v42, %v2241_v38  ;;  %v611_v48 = vpop.f32.mrb[23].mxu0  ;;  %v739_v49 = vpop.f32.mrb[23].mxu1 }
 0x109   :  { %1900 = vst [vmem:[#allocation3 + $0xc8] sm:$0xff] %v1844_v31   ;;  %v1110_v45 = vadd.f32 %v2246_v40, %v1039_v33  ;;  %v1040_v47 = vmul.f32 %v2000_v43, %v2241_v38  ;;  %v1076_v50 = vadd.f32 %v2246_v40, %v1005_v39  ;;  %v1108_v51 = vadd.f32 %v2246_v40, %v1037_v41 }
 0x10a   :  { %1883 = vst [vmem:[#allocation3 + $0x40] sm:$0xff] %v1759_v36   ;;  %1899 = vst [vmem:[#allocation3 + $0xc0] sm:$0xff] %v1839_v37   ;;  %v1006_v52 = vmul.f32 %v2241_v38, %v611_v48  ;;  %v1038_v53 = vmul.f32 %v2241_v38, %v739_v49  ;;  %v1079_v54 = vadd.f32 %v2246_v40, %v1008_v46  ;;  %v1142_v58 = vmax.f32 %v1078_v44, 0.0 }
 0x10b   :  { %v1111_v55 = vadd.f32 %v2246_v40, %v1040_v47  ;;  %v1174_v59 = vmax.f32 %v1110_v45, 0.0  ;;  %v1140_v62 = vmax.f32 %v1076_v50, 0.0  ;;  %v1172_v63 = vmax.f32 %v1108_v51, 0.0 }
 0x10c   :  { %v1077_v56 = vadd.f32 %v2246_v40, %v1006_v52  ;;  %v1109_v57 = vadd.f32 %v2246_v40, %v1038_v53  ;;  %v1143_v60 = vmax.f32 %v1079_v54, 0.0 }
 0x10d   :  { %v1175_v61 = vmax.f32 %v1111_v55, 0.0  ;;  %v1971_v2 = vpop.f32.mrb[24].mxu0  ;;  %v2003_v3 = vpop.f32.mrb[24].mxu1 }
 0x10e   :  { %v1141_v0 = vmax.f32 %v1077_v56, 0.0  ;;  %v1173_v1 = vmax.f32 %v1109_v57, 0.0  ;;  %v1774_v4 = vpack.c.bf16 %v1143_v60, %v1142_v58  ;;  %v1011_v6 = vmul.f32 %v1971_v2, %v2241_v38  ;;  %v624_v8 = vpop.f32.mrb[25].mxu0  ;;  %v752_v9 = vpop.f32.mrb[25].mxu1 }
 0x10f   :  { %v1854_v5 = vpack.c.bf16 %v1175_v61, %v1174_v59  ;;  %v1043_v7 = vmul.f32 %v2003_v3, %v2241_v38  ;;  %v1009_v12 = vmul.f32 %v2241_v38, %v624_v8  ;;  %v1041_v13 = vmul.f32 %v2241_v38, %v752_v9  ;;  %v1972_v14 = vpop.f32.mrb[26].mxu0  ;;  %v2004_v15 = vpop.f32.mrb[26].mxu1 }
 0x110   :  { %v1769_v10 = vpack.c.bf16 %v1141_v0, %v1140_v62  ;;  %v1849_v11 = vpack.c.bf16 %v1173_v1, %v1172_v63  ;;  %1886 = vst [vmem:[#allocation3 + $0x58] sm:$0xff] %v1774_v4   ;;  %v1082_v16 = vadd.f32 %v2246_v40, %v1011_v6  ;;  %v1012_v18 = vmul.f32 %v1972_v14, %v2241_v38  ;;  %v627_v20 = vpop.f32.mrb[27].mxu0  ;;  %v755_v21 = vpop.f32.mrb[27].mxu1 }
 0x111   :  { %1902 = vst [vmem:[#allocation3 + $0xd8] sm:$0xff] %v1854_v5   ;;  %v1114_v17 = vadd.f32 %v2246_v40, %v1043_v7  ;;  %v1044_v19 = vmul.f32 %v2004_v15, %v2241_v38  ;;  %v1080_v22 = vadd.f32 %v2246_v40, %v1009_v12  ;;  %v1112_v23 = vadd.f32 %v2246_v40, %v1041_v13 }
 0x112   :  { %1885 = vst [vmem:[#allocation3 + $0x50] sm:$0xff] %v1769_v10   ;;  %1901 = vst [vmem:[#allocation3 + $0xd0] sm:$0xff] %v1849_v11   ;;  %v1010_v24 = vmul.f32 %v2241_v38, %v627_v20  ;;  %v1042_v25 = vmul.f32 %v2241_v38, %v755_v21  ;;  %v1083_v26 = vadd.f32 %v2246_v40, %v1012_v18  ;;  %v1146_v30 = vmax.f32 %v1082_v16, 0.0 }
 0x113   :  { %v1115_v27 = vadd.f32 %v2246_v40, %v1044_v19  ;;  %v1178_v31 = vmax.f32 %v1114_v17, 0.0  ;;  %v1144_v34 = vmax.f32 %v1080_v22, 0.0  ;;  %v1176_v35 = vmax.f32 %v1112_v23, 0.0 }
 0x114   :  { %v1081_v28 = vadd.f32 %v2246_v40, %v1010_v24  ;;  %v1113_v29 = vadd.f32 %v2246_v40, %v1042_v25  ;;  %v1147_v32 = vmax.f32 %v1083_v26, 0.0 }
 0x115   :  { %v1179_v33 = vmax.f32 %v1115_v27, 0.0  ;;  %v1975_v39 = vpop.f32.mrb[28].mxu0  ;;  %v2007_v41 = vpop.f32.mrb[28].mxu1 }
 0x116   :  { %v1145_v36 = vmax.f32 %v1081_v28, 0.0  ;;  %v1177_v37 = vmax.f32 %v1113_v29, 0.0  ;;  %v1784_v42 = vpack.c.bf16 %v1147_v32, %v1146_v30  ;;  %v1015_v44 = vmul.f32 %v1975_v39, %v2241_v38  ;;  %v640_v46 = vpop.f32.mrb[29].mxu0  ;;  %v768_v47 = vpop.f32.mrb[29].mxu1 }
 0x117   :  { %v1864_v43 = vpack.c.bf16 %v1179_v33, %v1178_v31  ;;  %v1047_v45 = vmul.f32 %v2007_v41, %v2241_v38  ;;  %v1013_v50 = vmul.f32 %v2241_v38, %v640_v46  ;;  %v1045_v51 = vmul.f32 %v2241_v38, %v768_v47  ;;  %v1976_v52 = vpop.f32.mrb[30].mxu0  ;;  %v2008_v53 = vpop.f32.mrb[30].mxu1 }
 0x118   :  { %v1779_v48 = vpack.c.bf16 %v1145_v36, %v1144_v34  ;;  %v1859_v49 = vpack.c.bf16 %v1177_v37, %v1176_v35  ;;  %1888 = vst [vmem:[#allocation3 + $0x68] sm:$0xff] %v1784_v42   ;;  %v1086_v54 = vadd.f32 %v2246_v40, %v1015_v44  ;;  %v1016_v56 = vmul.f32 %v1976_v52, %v2241_v38  ;;  %v643_v58 = vpop.f32.mrb[31].mxu0  ;;  %v771_v59 = vpop.f32.mrb[31].mxu1 }
 0x119   :  { %1904 = vst [vmem:[#allocation3 + $0xe8] sm:$0xff] %v1864_v43   ;;  %v1118_v55 = vadd.f32 %v2246_v40, %v1047_v45  ;;  %v1048_v57 = vmul.f32 %v2008_v53, %v2241_v38  ;;  %v1084_v60 = vadd.f32 %v2246_v40, %v1013_v50  ;;  %v1116_v61 = vadd.f32 %v2246_v40, %v1045_v51 }
 0x11a   :  { %1887 = vst [vmem:[#allocation3 + $0x60] sm:$0xff] %v1779_v48   ;;  %1903 = vst [vmem:[#allocation3 + $0xe0] sm:$0xff] %v1859_v49   ;;  %v1014_v62 = vmul.f32 %v2241_v38, %v643_v58  ;;  %v1046_v63 = vmul.f32 %v2241_v38, %v771_v59  ;;  %v1087_v0 = vadd.f32 %v2246_v40, %v1016_v56  ;;  %v1150_v4 = vmax.f32 %v1086_v54, 0.0 }
 0x11b   :  { %v1119_v1 = vadd.f32 %v2246_v40, %v1048_v57  ;;  %v1182_v5 = vmax.f32 %v1118_v55, 0.0  ;;  %v1148_v8 = vmax.f32 %v1084_v60, 0.0  ;;  %v1180_v9 = vmax.f32 %v1116_v61, 0.0 }
 0x11c   :  { %v1085_v2 = vadd.f32 %v2246_v40, %v1014_v62  ;;  %v1117_v3 = vadd.f32 %v2246_v40, %v1046_v63  ;;  %v1151_v6 = vmax.f32 %v1087_v0, 0.0 }
 0x11d   :  { %v1183_v7 = vmax.f32 %v1119_v1, 0.0 }
 0x11e   :  { %v1149_v10 = vmax.f32 %v1085_v2, 0.0  ;;  %v1181_v11 = vmax.f32 %v1117_v3, 0.0  ;;  %v1794_v12 = vpack.c.bf16 %v1151_v6, %v1150_v4 }
 0x11f   :  { %v1874_v38 = vpack.c.bf16 %v1183_v7, %v1182_v5 }
 0x120   :  { %v1789_v13 = vpack.c.bf16 %v1149_v10, %v1148_v8  ;;  %v1869_v14 = vpack.c.bf16 %v1181_v11, %v1180_v9  ;;  %1890 = vst [vmem:[#allocation3 + $0x78] sm:$0xff] %v1794_v12  }
 0x121   :  { %1906 = vst [vmem:[#allocation3 + $0xf8] sm:$0xff] %v1874_v38  }
 0x122   :  { %1889 = vst [vmem:[#allocation3 + $0x70] sm:$0xff] %v1789_v13   ;;  %1905 = vst [vmem:[#allocation3 + $0xf0] sm:$0xff] %v1869_v14  }
 0x123   :  { %2062 = shalt.err (!%p2059_p4)
}
 0x124   :  { %s2063_s8 = scalar_lea.hbm %s2392_s4, 4096 }
 0x125   :  { %p2064_p5 = scmp.ne.s32.totalorder %s2392_s4, %s2063_s8  ;;  %p2067_p6 = scmp.lt.u32.totalorder %s2063_s8, %s2392_s4 }
 0x127   :  { %p2069_p7 = pnand %p2067_p6, %p2064_p5 }
 0x129   :  { %2072 = shalt.err (!%p2069_p7)
}
 0x12a   :  { %s2077_s13 = smov 64   ;;  %s2078_s14 = smov 4  }
 0x12b   :  { %1515 = dma.vmem_to_hbm [thread:$0]  %s1510_s2, 4096, %s2392_s4, [#allocation4], %s2077_s13, %s2077_s13, %s2078_s14  }
 0x12c   :  { %2073 = dma.done.wait [#allocation4], 4096  }
 0x12d   :  { %2074 = vsyncadd [#allocation4], 4294963200 }
 0x12e   :  { %1519 = vsyncpa [#allocation4], 1 }

</bundles_post_ra>
